<compile_context>
chip_gen: v6e
topology: v6e:2x2x1
jax: 0.10.0
libtpu: 0.0.40
codegen_flags: <defaults>
</compile_context>

<pallas_src>
import jax
import jax.numpy as jnp
from jax.experimental import pallas as pl
from jax.experimental.pallas import tpu as pltpu


def _qnet_kernel(s_ref, a_ref,
                 w1s_ref, w1a_ref, b1_ref,
                 w2_ref, b2_ref,
                 w3_ref, b3_ref,
                 w4_ref, b4_ref,
                 q_ref):
    """Fused 4-layer MLP on one batch tile: (Linear+ReLU) x3 -> Linear."""
    h = (jnp.dot(s_ref[...], w1s_ref[...], preferred_element_type=jnp.float32)
         + jnp.dot(a_ref[...], w1a_ref[...], preferred_element_type=jnp.float32)
         + b1_ref[...])
    h = jnp.maximum(h, 0.0)

    h = jnp.dot(h, w2_ref[...], preferred_element_type=jnp.float32) + b2_ref[...]
    h = jnp.maximum(h, 0.0)

    h = jnp.dot(h, w3_ref[...], preferred_element_type=jnp.float32) + b3_ref[...]
    h = jnp.maximum(h, 0.0)

    q = jnp.dot(h, w4_ref[...], preferred_element_type=jnp.float32) + b4_ref[...]
    q_ref[...] = q.astype(q_ref.dtype)


def qnetwork_forward(state, conti_action, params, *, block_m=512):
    """JAX wrapper. All matmul/ReLU compute runs inside the Pallas kernel; the
    only wrapper-side array work is an (optional) batch pad to a tile multiple."""
    w1s, w1a, b1, w2, b2, w3, b3, w4, b4 = params["q1"]
    B, num_inputs = state.shape
    act_dim = conti_action.shape[1]
    hid = w2.shape[0]
    hid2 = w3.shape[1]

    # Batch tile: at most block_m rows, multiple of 8 (sublane width).
    tm = min(block_m, max(8, ((B + 7) // 8) * 8))
    pad = (-B) % tm
    if pad:
        state = jnp.pad(state, ((0, pad), (0, 0)))
        conti_action = jnp.pad(conti_action, ((0, pad), (0, 0)))
    bp = B + pad
    grid = (bp // tm,)

    def row_spec(cols):
        return pl.BlockSpec((tm, cols), lambda i: (i, 0))

    def resident_spec(arr):
        # Constant block index -> stays resident in VMEM across grid steps.
        return pl.BlockSpec(arr.shape, lambda i: (0, 0))

    flops = 2 * bp * (num_inputs * hid + act_dim * hid + hid * hid
                      + hid * hid2 + hid2)
    param_elems = sum(int(p.size) for p in params["q1"])
    bytes_accessed = 4 * (bp * (num_inputs + act_dim + 1) + param_elems)

    q = pl.pallas_call(
        _qnet_kernel,
        out_shape=jax.ShapeDtypeStruct((bp, 1), jnp.float32),
        grid=grid,
        in_specs=[
            row_spec(num_inputs),          # state tile
            row_spec(act_dim),             # conti_action tile
            resident_spec(w1s), resident_spec(w1a), resident_spec(b1),
            resident_spec(w2), resident_spec(b2),
            resident_spec(w3), resident_spec(b3),
            resident_spec(w4), resident_spec(b4),
        ],
        out_specs=pl.BlockSpec((tm, 1), lambda i: (i, 0)),
        compiler_params=pltpu.CompilerParams(
            dimension_semantics=("parallel",)),
        cost_estimate=pl.CostEstimate(
            flops=flops, transcendentals=0, bytes_accessed=bytes_accessed),
    )(state, conti_action, w1s, w1a, b1, w2, b2, w3, b3, w4, b4)

    if pad:
        q = q[:B]
    # forward() applies Q1_subnet to both identical concatenations -> x1 == x2.
    return q, q


def _xavier_normal(key, fan_in, fan_out, dtype=jnp.float32):
    # Matches torch.nn.init.xavier_normal_ (gain=1): std = sqrt(2/(fan_in+fan_out)).
    std = (2.0 / (fan_in + fan_out)) ** 0.5
    # Stored as [in, out] so the kernel computes x @ W directly.
    return (jax.random.normal(key, (fan_in, fan_out), dtype) * std).astype(dtype)


def init_qnetwork_params(key, num_inputs=32, hidden_dim=32, conti_dim=6):
    """Deterministic parameter init mirroring QNetwork.__init__ / weights_init_.
    The first-layer weight is generated at full fan-in (num_inputs + conti_dim,
    matching xavier statistics) and then pre-split so the kernel can skip the
    state/action concatenation."""
    def init_mlp(key, n_in, n_hid, n_out):
        k1, k2, k3, k4 = jax.random.split(key, 4)
        w1 = _xavier_normal(k1, n_in, n_hid)
        w1s, w1a = w1[: n_in - conti_dim], w1[n_in - conti_dim:]
        b1 = jnp.zeros((1, n_hid), jnp.float32)
        w2 = _xavier_normal(k2, n_hid, n_hid)
        b2 = jnp.zeros((1, n_hid), jnp.float32)
        w3 = _xavier_normal(k3, n_hid, n_hid // 2)
        b3 = jnp.zeros((1, n_hid // 2), jnp.float32)
        w4 = _xavier_normal(k4, n_hid // 2, n_out)
        b4 = jnp.zeros((1, n_out), jnp.float32)
        return (w1s, w1a, b1, w2, b2, w3, b3, w4, b4)

    kq1, kq2 = jax.random.split(key)
    return {
        "q1": init_mlp(kq1, num_inputs + conti_dim, hidden_dim, 1),
        # Q2_subnet is constructed by the module but never used in forward();
        # kept for structural fidelity.
        "q2": init_mlp(kq2, num_inputs + conti_dim, hidden_dim, 1),
    }


def _reference_forward(state, conti_action, params):
    w1s, w1a, b1, w2, b2, w3, b3, w4, b4 = params["q1"]
    sa = jnp.concatenate([state, conti_action], axis=1)
    w1 = jnp.concatenate([w1s, w1a], axis=0)
    h = jnp.maximum(sa @ w1 + b1, 0.0)
    h = jnp.maximum(h @ w2 + b2, 0.0)
    h = jnp.maximum(h @ w3 + b3, 0.0)
    q = h @ w4 + b4
    return q, q


if __name__ == "__main__":
    key = jax.random.PRNGKey(0)
    k_params, k_state, k_action = jax.random.split(key, 3)

    # Small shapes consistent with the module's forward: state (B, num_inputs),
    # continuous action (B, 6). block_m=128 -> 2 batch tiles, exercising the grid.
    batch = 256
    num_inputs = 32
    hidden_dim = 32

    params = init_qnetwork_params(k_params, num_inputs=num_inputs,
                                  hidden_dim=hidden_dim)
    state = jax.random.normal(k_state, (batch, num_inputs), jnp.float32)
    conti_action = jax.random.normal(k_action, (batch, 6), jnp.float32)

    q1, q2 = qnetwork_forward(state, conti_action, params, block_m=128)
    q1 = jax.block_until_ready(q1)
    q2 = jax.block_until_ready(q2)

    # Sanity check against a plain-JAX reference.
    r1, r2 = _reference_forward(state, conti_action, params)
    assert q1.shape == (batch, 1) and q2.shape == (batch, 1)
    assert jnp.allclose(q1, r1, atol=3e-5), "q1 mismatch vs reference"
    assert jnp.allclose(q2, r2, atol=3e-5), "q2 mismatch vs reference"

    print("KERNEL_OK")
</pallas_src>

<mosaic_0001>
module attributes {stable_mosaic.version = 11 : i64} {
  func.func @_qnet_kernel(%arg0: i32, %arg1: memref<128x32xf32, #tpu.memory_space<vmem>>, %arg2: memref<128x6xf32, #tpu.memory_space<vmem>>, %arg3: memref<32x32xf32, #tpu.memory_space<vmem>>, %arg4: memref<6x32xf32, #tpu.memory_space<vmem>>, %arg5: memref<1x32xf32, #tpu.memory_space<vmem>>, %arg6: memref<32x32xf32, #tpu.memory_space<vmem>>, %arg7: memref<1x32xf32, #tpu.memory_space<vmem>>, %arg8: memref<32x16xf32, #tpu.memory_space<vmem>>, %arg9: memref<1x16xf32, #tpu.memory_space<vmem>>, %arg10: memref<16x1xf32, #tpu.memory_space<vmem>>, %arg11: memref<1x1xf32, #tpu.memory_space<vmem>>, %arg12: memref<128x1xf32, #tpu.memory_space<vmem>>) attributes {dimension_semantics = [#tpu.dimension_semantics<parallel>], iteration_bounds = array<i64: 2>, scalar_prefetch = 0 : i64, scratch_operands = 0 : i64, tpu.core_type = #tpu.core_type<tc>, window_params = [{transform_indices = @transform_0, window_bounds = array<i64: 128, 32>}, {transform_indices = @transform_1, window_bounds = array<i64: 128, 6>}, {pipeline_mode = #tpu.pipeline_mode<synchronous>, transform_indices = @transform_2, window_bounds = array<i64: 32, 32>}, {pipeline_mode = #tpu.pipeline_mode<synchronous>, transform_indices = @transform_3, window_bounds = array<i64: 6, 32>}, {pipeline_mode = #tpu.pipeline_mode<synchronous>, transform_indices = @transform_4, window_bounds = array<i64: 1, 32>}, {pipeline_mode = #tpu.pipeline_mode<synchronous>, transform_indices = @transform_5, window_bounds = array<i64: 32, 32>}, {pipeline_mode = #tpu.pipeline_mode<synchronous>, transform_indices = @transform_6, window_bounds = array<i64: 1, 32>}, {pipeline_mode = #tpu.pipeline_mode<synchronous>, transform_indices = @transform_7, window_bounds = array<i64: 32, 16>}, {pipeline_mode = #tpu.pipeline_mode<synchronous>, transform_indices = @transform_8, window_bounds = array<i64: 1, 16>}, {pipeline_mode = #tpu.pipeline_mode<synchronous>, transform_indices = @transform_9, window_bounds = array<i64: 16, 1>}, {pipeline_mode = #tpu.pipeline_mode<synchronous>, transform_indices = @transform_10, window_bounds = array<i64: 1, 1>}, {transform_indices = @transform_11, window_bounds = array<i64: 128, 1>}]} {
    %c0 = arith.constant 0 : index
    %c0_0 = arith.constant 0 : index
    %0 = vector.load %arg1[%c0, %c0_0] : memref<128x32xf32, #tpu.memory_space<vmem>>, vector<128x32xf32>
    %c0_1 = arith.constant 0 : index
    %c0_2 = arith.constant 0 : index
    %1 = vector.load %arg3[%c0_1, %c0_2] : memref<32x32xf32, #tpu.memory_space<vmem>>, vector<32x32xf32>
    %cst = arith.constant dense<0.000000e+00> : vector<128x32xf32>
    %2 = tpu.matmul %0, %1, %cst {dimension_numbers = #tpu.dot_dimension_numbers<[1], [0], [0], [1], [0, 0, 1, 1], [], []>} : vector<128x32xf32>, vector<32x32xf32>, vector<128x32xf32> -> vector<128x32xf32>
    %c0_3 = arith.constant 0 : index
    %c0_4 = arith.constant 0 : index
    %3 = vector.load %arg2[%c0_3, %c0_4] : memref<128x6xf32, #tpu.memory_space<vmem>>, vector<128x6xf32>
    %c0_5 = arith.constant 0 : index
    %c0_6 = arith.constant 0 : index
    %4 = vector.load %arg4[%c0_5, %c0_6] : memref<6x32xf32, #tpu.memory_space<vmem>>, vector<6x32xf32>
    %cst_7 = arith.constant dense<0.000000e+00> : vector<128x32xf32>
    %5 = tpu.matmul %3, %4, %cst_7 {dimension_numbers = #tpu.dot_dimension_numbers<[1], [0], [0], [1], [0, 0, 1, 1], [], []>} : vector<128x6xf32>, vector<6x32xf32>, vector<128x32xf32> -> vector<128x32xf32>
    %6 = arith.addf %2, %5 : vector<128x32xf32>
    %c0_8 = arith.constant 0 : index
    %c0_9 = arith.constant 0 : index
    %7 = vector.load %arg5[%c0_8, %c0_9] : memref<1x32xf32, #tpu.memory_space<vmem>>, vector<1x32xf32>
    %8 = vector.broadcast %7 : vector<1x32xf32> to vector<128x32xf32>
    %9 = arith.addf %6, %8 : vector<128x32xf32>
    %cst_10 = arith.constant 0.000000e+00 : f32
    %10 = vector.broadcast %cst_10 : f32 to vector<128x32xf32>
    %11 = arith.maximumf %9, %10 : vector<128x32xf32>
    %c0_11 = arith.constant 0 : index
    %c0_12 = arith.constant 0 : index
    %12 = vector.load %arg6[%c0_11, %c0_12] : memref<32x32xf32, #tpu.memory_space<vmem>>, vector<32x32xf32>
    %cst_13 = arith.constant dense<0.000000e+00> : vector<128x32xf32>
    %13 = tpu.matmul %11, %12, %cst_13 {dimension_numbers = #tpu.dot_dimension_numbers<[1], [0], [0], [1], [0, 0, 1, 1], [], []>} : vector<128x32xf32>, vector<32x32xf32>, vector<128x32xf32> -> vector<128x32xf32>
    %c0_14 = arith.constant 0 : index
    %c0_15 = arith.constant 0 : index
    %14 = vector.load %arg7[%c0_14, %c0_15] : memref<1x32xf32, #tpu.memory_space<vmem>>, vector<1x32xf32>
    %15 = vector.broadcast %14 : vector<1x32xf32> to vector<128x32xf32>
    %16 = arith.addf %13, %15 : vector<128x32xf32>
    %cst_16 = arith.constant 0.000000e+00 : f32
    %17 = vector.broadcast %cst_16 : f32 to vector<128x32xf32>
    %18 = arith.maximumf %16, %17 : vector<128x32xf32>
    %c0_17 = arith.constant 0 : index
    %c0_18 = arith.constant 0 : index
    %19 = vector.load %arg8[%c0_17, %c0_18] : memref<32x16xf32, #tpu.memory_space<vmem>>, vector<32x16xf32>
    %cst_19 = arith.constant dense<0.000000e+00> : vector<128x16xf32>
    %20 = tpu.matmul %18, %19, %cst_19 {dimension_numbers = #tpu.dot_dimension_numbers<[1], [0], [0], [1], [0, 0, 1, 1], [], []>} : vector<128x32xf32>, vector<32x16xf32>, vector<128x16xf32> -> vector<128x16xf32>
    %c0_20 = arith.constant 0 : index
    %c0_21 = arith.constant 0 : index
    %21 = vector.load %arg9[%c0_20, %c0_21] : memref<1x16xf32, #tpu.memory_space<vmem>>, vector<1x16xf32>
    %22 = vector.broadcast %21 : vector<1x16xf32> to vector<128x16xf32>
    %23 = arith.addf %20, %22 : vector<128x16xf32>
    %cst_22 = arith.constant 0.000000e+00 : f32
    %24 = vector.broadcast %cst_22 : f32 to vector<128x16xf32>
    %25 = arith.maximumf %23, %24 : vector<128x16xf32>
    %c0_23 = arith.constant 0 : index
    %c0_24 = arith.constant 0 : index
    %26 = vector.load %arg10[%c0_23, %c0_24] : memref<16x1xf32, #tpu.memory_space<vmem>>, vector<16x1xf32>
    %cst_25 = arith.constant dense<0.000000e+00> : vector<128x1xf32>
    %27 = tpu.matmul %25, %26, %cst_25 {dimension_numbers = #tpu.dot_dimension_numbers<[1], [0], [0], [1], [0, 0, 1, 1], [], []>} : vector<128x16xf32>, vector<16x1xf32>, vector<128x1xf32> -> vector<128x1xf32>
    %c0_26 = arith.constant 0 : index
    %c0_27 = arith.constant 0 : index
    %28 = vector.load %arg11[%c0_26, %c0_27] : memref<1x1xf32, #tpu.memory_space<vmem>>, vector<1x1xf32>
    %29 = vector.broadcast %28 : vector<1x1xf32> to vector<128x1xf32>
    %30 = arith.addf %27, %29 : vector<128x1xf32>
    %c0_28 = arith.constant 0 : index
    %c0_29 = arith.constant 0 : index
    %31 = vector.load %arg12[%c0_28, %c0_29] : memref<128x1xf32, #tpu.memory_space<vmem>>, vector<128x1xf32>
    tpu.vector_store %arg12[%c0_28, %c0_29], %30 {strides = array<i32>} : memref<128x1xf32, #tpu.memory_space<vmem>>, vector<128x1xf32>,
    return
  }
  func.func @transform_0(%arg0: i32) -> (i32, i32) {
    %c0_i32 = arith.constant 0 : i32
    %c0_i32_0 = arith.constant 0 : i32
    return %arg0, %c0_i32 : i32, i32
  }
  func.func @transform_1(%arg0: i32) -> (i32, i32) {
    %c0_i32 = arith.constant 0 : i32
    %c0_i32_0 = arith.constant 0 : i32
    return %arg0, %c0_i32 : i32, i32
  }
  func.func @transform_2(%arg0: i32) -> (i32, i32) {
    %c0_i32 = arith.constant 0 : i32
    %c0_i32_0 = arith.constant 0 : i32
    %c0_i32_1 = arith.constant 0 : i32
    return %c0_i32, %c0_i32_0 : i32, i32
  }
  func.func @transform_3(%arg0: i32) -> (i32, i32) {
    %c0_i32 = arith.constant 0 : i32
    %c0_i32_0 = arith.constant 0 : i32
    %c0_i32_1 = arith.constant 0 : i32
    return %c0_i32, %c0_i32_0 : i32, i32
  }
  func.func @transform_4(%arg0: i32) -> (i32, i32) {
    %c0_i32 = arith.constant 0 : i32
    %c0_i32_0 = arith.constant 0 : i32
    %c0_i32_1 = arith.constant 0 : i32
    return %c0_i32, %c0_i32_0 : i32, i32
  }
  func.func @transform_5(%arg0: i32) -> (i32, i32) {
    %c0_i32 = arith.constant 0 : i32
    %c0_i32_0 = arith.constant 0 : i32
    %c0_i32_1 = arith.constant 0 : i32
    return %c0_i32, %c0_i32_0 : i32, i32
  }
  func.func @transform_6(%arg0: i32) -> (i32, i32) {
    %c0_i32 = arith.constant 0 : i32
    %c0_i32_0 = arith.constant 0 : i32
    %c0_i32_1 = arith.constant 0 : i32
    return %c0_i32, %c0_i32_0 : i32, i32
  }
  func.func @transform_7(%arg0: i32) -> (i32, i32) {
    %c0_i32 = arith.constant 0 : i32
    %c0_i32_0 = arith.constant 0 : i32
    %c0_i32_1 = arith.constant 0 : i32
    return %c0_i32, %c0_i32_0 : i32, i32
  }
  func.func @transform_8(%arg0: i32) -> (i32, i32) {
    %c0_i32 = arith.constant 0 : i32
    %c0_i32_0 = arith.constant 0 : i32
    %c0_i32_1 = arith.constant 0 : i32
    return %c0_i32, %c0_i32_0 : i32, i32
  }
  func.func @transform_9(%arg0: i32) -> (i32, i32) {
    %c0_i32 = arith.constant 0 : i32
    %c0_i32_0 = arith.constant 0 : i32
    %c0_i32_1 = arith.constant 0 : i32
    return %c0_i32, %c0_i32_0 : i32, i32
  }
  func.func @transform_10(%arg0: i32) -> (i32, i32) {
    %c0_i32 = arith.constant 0 : i32
    %c0_i32_0 = arith.constant 0 : i32
    %c0_i32_1 = arith.constant 0 : i32
    return %c0_i32, %c0_i32_0 : i32, i32
  }
  func.func @transform_11(%arg0: i32) -> (i32, i32) {
    %c0_i32 = arith.constant 0 : i32
    %c0_i32_0 = arith.constant 0 : i32
    return %arg0, %c0_i32 : i32, i32
  }
}

</mosaic_0001>

<bundles_post_ra>
// kernel: tpu_custom_call.1
= control target key start
LH: loop header
LB: loop body
LE: loop exit
PB: predicated region body
PF: predicated region fallthrough
CT: control target
= control target key end

     0   :  { %s2034_s19 = smov 0   ;;  %s2296_s0 = inlined_call_operand.vmem [shape: f32[256,32], index: 0, kind: input, shape index: {}]   ;;  %s2297_s1 = inlined_call_operand.vmem [shape: f32[256,6], index: 1, kind: input, shape index: {}]   ;;  %s2298_s2 = inlined_call_operand.vmem [shape: f32[32,32], index: 2, kind: input, shape index: {}]   ;;  %s2299_s3 = inlined_call_operand.vmem [shape: f32[6,32], index: 3, kind: input, shape index: {}]   ;;  %s2300_s4 = inlined_call_operand.vmem [shape: f32[1,32], index: 4, kind: input, shape index: {}]   ;;  %s2301_s5 = inlined_call_operand.vmem [shape: f32[32,32], index: 5, kind: input, shape index: {}]   ;;  %s2302_s6 = inlined_call_operand.vmem [shape: f32[1,32], index: 6, kind: input, shape index: {}]   ;;  %s2303_s7 = inlined_call_operand.vmem [shape: f32[32,16], index: 7, kind: input, shape index: {}]   ;;  %s2304_s8 = inlined_call_operand.vmem [shape: f32[1,16], index: 8, kind: input, shape index: {}]   ;;  %s2305_s9 = inlined_call_operand.vmem [shape: f32[16,1], index: 9, kind: input, shape index: {}]   ;;  %s2306_s10 = inlined_call_operand.<no memory space> [shape: f32[1,1], index: 10, kind: input, shape index: {}]   ;;  %s2307_s11 = inlined_call_operand.vmem [shape: f32[256,1], index: 11, kind: output, shape index: {}]  }
   0x1   :  { %v16_v0 = vstv %s2306_s10 }
   0x2   :  { %17 = vst [vmem:[#allocation2] sm:$0x1] %v16_v0 }
   0x3 LB: > { %s1610_s20 = sadd.s32 4294967295, %s1969_s19   ;;  %p1614_p0 = scmp.ge.s32.totalorder %s1969_s19, 1  ;;  %s1969_s19 = sphi %s2034_s19, %s23_s19  }
   0x4   : > { %p351_p1 = scmp.lt.s32.totalorder %s1969_s19, 3 }
   0x6   : > { %p352_p2 = pnand %p1614_p0, %p351_p1 }
   0x7   : > { %s1615_s10 = sshll.u32 (!%p352_p2), %s1610_s20, 4 }
   0x8   : > { %355 = sbr.rel (%p352_p2) target bundleno = 862 (0x35e), region = 64  ;;  %p397_p3 = scmp.lt.s32.totalorder (!%p352_p2), %s1615_s10, 31 }
   0xd   : > { %v450_v1 = vld [vmem:[%s2299_s3] sm:$0x3f]  ;;  %vm500_vm0 = vcmask 1045504   ;;  %v433_v2 = vld [vmem:[%s2298_s2 + $0x18] sm:$0xff]  ;;  %s2309_s10 = smov (!%p397_p3, %s1615_s10), 31  ;;  %vm451_vm1 = vcmask 48128  }
   0xe   : > { %1953 = vmatprep.subr.msk.mxu1 %vm500_vm0, %v450_v1  ;;  %1803 = vmatprep.subr.msk.mxu0 %vm500_vm0, %v450_v1  ;;  %s2048_s25 = sshll.u32 %s2309_s10, 3  ;;  %v432_v6 = vld [vmem:[%s2298_s2 + $0x10] sm:$0xff]  ;;  %v431_v9 = vld [vmem:[%s2298_s2 + $0x8] sm:$0xff]  ;;  %v430_v12 = vld [vmem:[%s2298_s2] sm:$0xff]  ;;  %vm649_vm2 = vcmask 261120   ;;  %vm1331_vm3 = vcmask 130048  }
   0xf   : > { %1954 = vmatpush3.msk.msra.mxu1 %vm500_vm0, %v450_v1  ;;  %1804 = vmatpush3.msk.msra.mxu0 %vm500_vm0, %v450_v1  ;;  %s2054_s28 = scalar_lea.vmem %s2297_s1, %s2048_s25  ;;  %s2089_s18 = scalar_lea.vmem %s2296_s0, %s2048_s25  ;;  %v885_v38 = vld [vmem:[%s2301_s5 + $0x18] sm:$0xff]  ;;  %v884_v39 = vld [vmem:[%s2301_s5 + $0x10] sm:$0xff]  ;;  %v883_v40 = vld [vmem:[%s2301_s5 + $0x8] sm:$0xff]  ;;  %vm1525_vm4 = vcmask 7168  }
  0x10   : > { %1829 = vmatprep.subr.mxu1 %v433_v2  ;;  %v442_v3 = vld [vmem:[%s2054_s28 + $0x40] sm:$0xff]  ;;  %v443_v4 = vld [vmem:[%s2054_s28 + $0x48] sm:$0xff]  ;;  %v444_v5 = vld [vmem:[%s2054_s28 + $0x50] sm:$0xff]  ;;  %1861 = vmatprep.subr.mxu0 %v885_v38  ;;  %s2259_s30 = scalar_lea.vmem %s2307_s11, %s2048_s25 }
  0x11   : > { %1817 = vmatprep.mubr.msk.f32.mxu1 %vm451_vm1, %v442_v3  ;;  %v434_v7 = vld [vmem:[%s2054_s28] sm:$0xff]  ;;  %v445_v8 = vld [vmem:[%s2054_s28 + $0x58] sm:$0xff]  ;;  %v435_v10 = vld [vmem:[%s2054_s28 + $0x8] sm:$0xff] }
  0x12   : > { %1818 = vmatmul.mubr.msk.f32.vlgmr.msra.gmra.mxu1 %vm451_vm1, %v443_v4  ;;  %v446_v11 = vld [vmem:[%s2054_s28 + $0x60] sm:$0xff]  ;;  %1805 = vmatprep.mubr.msk.f32.mxu0 %vm451_vm1, %v434_v7  ;;  %v436_v13 = vld [vmem:[%s2054_s28 + $0x10] sm:$0xff]  ;;  %v437_v14 = vld [vmem:[%s2054_s28 + $0x18] sm:$0xff] }
  0x13   : > { %1830 = vmatpush3.msra.mxu1 %v433_v2  ;;  %1820 = vmatprep.mubr.msk.f32.mxu1 %vm451_vm1, %v444_v5  ;;  %v447_v15 = vld [vmem:[%s2054_s28 + $0x68] sm:$0xff]  ;;  %v438_v16 = vld [vmem:[%s2054_s28 + $0x20] sm:$0xff]  ;;  %v448_v17 = vld [vmem:[%s2054_s28 + $0x70] sm:$0xff] }
  0x14   : > { %1831 = vmatprep.subr.mxu1 %v432_v6  ;;  %1806 = vmatmul.mubr.msk.f32.vlgmr.msra.gmra.mxu0 %vm451_vm1, %v435_v10  ;;  %v439_v18 = vld [vmem:[%s2054_s28 + $0x28] sm:$0xff]  ;;  %v449_v19 = vld [vmem:[%s2054_s28 + $0x78] sm:$0xff]  ;;  %v440_v20 = vld [vmem:[%s2054_s28 + $0x30] sm:$0xff] }
  0x15   : > { %1832 = vmatpush3.msra.mxu1 %v432_v6  ;;  %1808 = vmatprep.mubr.msk.f32.mxu0 %vm451_vm1, %v436_v13  ;;  %v414_v21 = vld [vmem:[%s2089_s18] sm:$0xff]  ;;  %v441_v22 = vld [vmem:[%s2054_s28 + $0x38] sm:$0xff]  ;;  %v415_v23 = vld [vmem:[%s2089_s18 + $0x8] sm:$0xff] }
  0x16   : > { %1821 = vmatmul.mubr.msk.f32.gmra.mxu1 %vm451_vm1, %v445_v8  ;;  %1833 = vmatprep.subr.mxu1 %v431_v9  ;;  %v416_v24 = vld [vmem:[%s2089_s18 + $0x10] sm:$0xff]  ;;  %v417_v25 = vld [vmem:[%s2089_s18 + $0x18] sm:$0xff]  ;;  %v418_v26 = vld [vmem:[%s2089_s18 + $0x20] sm:$0xff] }
  0x17   : > { %1823 = vmatprep.mubr.msk.f32.mxu1 %vm451_vm1, %v446_v11  ;;  %1834 = vmatpush3.msra.mxu1 %v431_v9  ;;  %v419_v27 = vld [vmem:[%s2089_s18 + $0x28] sm:$0xff]  ;;  %v420_v28 = vld [vmem:[%s2089_s18 + $0x30] sm:$0xff]  ;;  %v421_v29 = vld [vmem:[%s2089_s18 + $0x38] sm:$0xff] }
  0x18   : > { %1835 = vmatprep.subr.mxu1 %v430_v12  ;;  %1809 = vmatmul.mubr.msk.f32.gmra.mxu0 %vm451_vm1, %v437_v14  ;;  %v422_v30 = vld [vmem:[%s2089_s18 + $0x40] sm:$0xff]  ;;  %v423_v31 = vld [vmem:[%s2089_s18 + $0x48] sm:$0xff]  ;;  %v424_v32 = vld [vmem:[%s2089_s18 + $0x50] sm:$0xff] }
  0x19   : > { %1836 = vmatpush3.msra.mxu1 %v430_v12  ;;  %1811 = vmatprep.mubr.msk.f32.mxu0 %vm451_vm1, %v438_v16  ;;  %v425_v33 = vld [vmem:[%s2089_s18 + $0x58] sm:$0xff]  ;;  %v426_v34 = vld [vmem:[%s2089_s18 + $0x60] sm:$0xff]  ;;  %v427_v35 = vld [vmem:[%s2089_s18 + $0x68] sm:$0xff] }
  0x1a   : > { %1824 = vmatmul.mubr.msk.f32.gmra.mxu1 %vm451_vm1, %v447_v15  ;;  %v428_v36 = vld [vmem:[%s2089_s18 + $0x70] sm:$0xff]  ;;  %v429_v37 = vld [vmem:[%s2089_s18 + $0x78] sm:$0xff]  ;;  %1862 = vmatpush3.msra.mxu0 %v885_v38  ;;  %v882_v41 = vld [vmem:[%s2301_s5] sm:$0xff] }
  0x1b   : > { %1826 = vmatprep.mubr.msk.f32.mxu1 %vm451_vm1, %v448_v17  ;;  %1863 = vmatprep.subr.mxu0 %v884_v39  ;;  %v1105_v42 = vld [vmem:[%s2303_s7 + $0x18] sm:$0xff]  ;;  %v1104_v43 = vld [vmem:[%s2303_s7 + $0x10] sm:$0xff]  ;;  %v1103_v44 = vld [vmem:[%s2303_s7 + $0x8] sm:$0xff] }
  0x1c   : > { %1812 = vmatmul.mubr.msk.f32.gmra.mxu0 %vm451_vm1, %v439_v18  ;;  %1893 = vmatprep.subr.mxu1 %v1105_v42  ;;  %v1102_v45 = vld [vmem:[%s2303_s7] sm:$0xff] }
  0x1d   : > { %1814 = vmatprep.mubr.msk.f32.mxu0 %vm451_vm1, %v440_v20  ;;  %1864 = vmatpush3.msra.mxu0 %v884_v39  ;;  %v2172_v60 = vld [vmem:[%s2300_s4] ss:$0 sm:$0xff] }
  0x1e   : > { %1827 = vmatmul.mubr.msk.f32.gmra.mxu1 %vm451_vm1, %v449_v19  ;;  %1865 = vmatprep.subr.mxu0 %v883_v40 }
  0x1f   : > { %1837 = vmatprep.mubr.msk.f32.mxu1 %vm649_vm2, %v414_v21  ;;  %1866 = vmatpush3.msra.mxu0 %v883_v40 }
  0x20   : > { %1815 = vmatmul.mubr.msk.f32.gmra.mxu0 %vm451_vm1, %v441_v22  ;;  %1867 = vmatprep.subr.mxu0 %v882_v41 }
  0x21   : > { %1868 = vmatpush3.msra.mxu0 %v882_v41 }
  0x22   : > { %1838 = vmatmul.mubr.msk.f32.vlgmr.msra.gmra.mxu1 %vm649_vm2, %v415_v23 }
  0x23   : > { %1840 = vmatprep.mubr.msk.f32.mxu1 %vm649_vm2, %v416_v24  ;;  %1894 = vmatpush3.msra.mxu1 %v1105_v42 }
  0x24   : > { %1895 = vmatprep.subr.mxu1 %v1104_v43 }
  0x25   : > { %1896 = vmatpush3.msra.mxu1 %v1104_v43 }
  0x26   : > { %1841 = vmatmul.mubr.msk.f32.gmra.mxu1 %vm649_vm2, %v417_v25  ;;  %1897 = vmatprep.subr.mxu1 %v1103_v44 }
  0x27   : > { %1843 = vmatprep.mubr.msk.f32.mxu1 %vm649_vm2, %v418_v26  ;;  %1898 = vmatpush3.msra.mxu1 %v1103_v44 }
  0x28   : > { %1899 = vmatprep.subr.mxu1 %v1102_v45 }
  0x29   : > { %1900 = vmatpush3.msra.mxu1 %v1102_v45 }
  0x2a   : > { %1844 = vmatmul.mubr.msk.f32.gmra.mxu1 %vm649_vm2, %v419_v27 }
  0x2b   : > { %1846 = vmatprep.mubr.msk.f32.mxu1 %vm649_vm2, %v420_v28 }
  0x2e   : > { %1847 = vmatmul.mubr.msk.f32.gmra.mxu1 %vm649_vm2, %v421_v29 }
  0x2f   : > { %1849 = vmatprep.mubr.msk.f32.mxu1 %vm649_vm2, %v422_v30 }
  0x32   : > { %1850 = vmatmul.mubr.msk.f32.gmra.mxu1 %vm649_vm2, %v423_v31 }
  0x33   : > { %1852 = vmatprep.mubr.msk.f32.mxu1 %vm649_vm2, %v424_v32 }
  0x36   : > { %1853 = vmatmul.mubr.msk.f32.gmra.mxu1 %vm649_vm2, %v425_v33 }
  0x37   : > { %1855 = vmatprep.mubr.msk.f32.mxu1 %vm649_vm2, %v426_v34 }
  0x3a   : > { %1856 = vmatmul.mubr.msk.f32.gmra.mxu1 %vm649_vm2, %v427_v35 }
  0x3b   : > { %1858 = vmatprep.mubr.msk.f32.mxu1 %vm649_vm2, %v428_v36 }
  0x3e   : > { %1859 = vmatmul.mubr.msk.f32.gmra.mxu1 %vm649_vm2, %v429_v37 }
  0xd2   : > { %v1819_v46 = vpop.f32.mrf.mxu1 }
  0xd4   : > { %v610_v47 = vpop.f32.mrf.mxu1  ;;  %v1807_v48 = vpop.f32.mrf.mxu0 }
  0xd6   : > { %v1822_v49 = vpop.f32.mrf.mxu1  ;;  %v570_v51 = vpop.f32.mrf.mxu0 }
  0xd8   : > { %v2159_v50 = vpop.f32.mrf.mxu1  ;;  %v1810_v54 = vpop.f32.mrf.mxu0 }
  0xda   : > { %v2161_v52 = vpop.f32.mrf.mxu1  ;;  %v580_v57 = vpop.f32.mrf.mxu0 }
  0xdc   : > { %v2163_v53 = vpop.f32.mrf.mxu1  ;;  %v1813_v62 = vpop.f32.mrf.mxu0 }
  0xde   : > { %v2165_v55 = vpop.f32.mrf.mxu1  ;;  %v590_v5 = vpop.f32.mrf.mxu0 }
  0xe0   : > { %v2167_v56 = vpop.f32.mrf.mxu1  ;;  %v1816_v13 = vpop.f32.mrf.mxu0 }
  0xe2   : > { %v1839_v58 = vpop.f32.mrf.mxu1  ;;  %v600_v22 = vpop.f32.mrf.mxu0 }
  0xe3   : > { %v770_v59 = vadd.f32 %v1839_v58, %v1807_v48 }
  0xe4   : > { %v764_v61 = vpop.f32.mrf.mxu1 }
  0xe5   : > { %v765_v63 = vadd.f32 %v764_v61, %v570_v51  ;;  %v851_v0 = vadd.f32 %v2172_v60, %v770_v59 }
  0xe6   : > { %v1842_v1 = vpop.f32.mrf.mxu1 }
  0xe7   : > { %v850_v2 = vadd.f32 %v2172_v60, %v765_v63  ;;  %v780_v3 = vadd.f32 %v1842_v1, %v1810_v54  ;;  %v867_v8 = vmax.f32 %v851_v0, 0.0 }
  0xe8   : > { %v774_v4 = vpop.f32.mrf.mxu1 }
  0xe9   : > { %v866_v6 = vmax.f32 %v850_v2, 0.0  ;;  %v775_v7 = vadd.f32 %v774_v4, %v580_v57  ;;  %v853_v9 = vadd.f32 %v2172_v60, %v780_v3 }
  0xea   : > { %v1845_v10 = vpop.f32.mrf.mxu1 }
  0xeb   : > { %v852_v11 = vadd.f32 %v2172_v60, %v775_v7  ;;  %v790_v12 = vadd.f32 %v1845_v10, %v1813_v62  ;;  %1869 = vmatprep.mubr.msk.f32.mxu0 %vm649_vm2, %v866_v6  ;;  %v869_v17 = vmax.f32 %v853_v9, 0.0 }
  0xec   : > { %v784_v14 = vpop.f32.mrf.mxu1  ;;  %1870 = vmatmul.mubr.msk.f32.vlgmr.msra.gmra.mxu0 %vm649_vm2, %v867_v8 }
  0xed   : > { %v868_v15 = vmax.f32 %v852_v11, 0.0  ;;  %v785_v16 = vadd.f32 %v784_v14, %v590_v5  ;;  %v855_v18 = vadd.f32 %v2172_v60, %v790_v12 }
  0xee   : > { %v1848_v19 = vpop.f32.mrf.mxu1 }
  0xef   : > { %v854_v20 = vadd.f32 %v2172_v60, %v785_v16  ;;  %v800_v21 = vadd.f32 %v1848_v19, %v1816_v13  ;;  %1872 = vmatprep.mubr.msk.f32.mxu0 %vm649_vm2, %v868_v15  ;;  %v871_v26 = vmax.f32 %v855_v18, 0.0 }
  0xf0   : > { %v794_v23 = vpop.f32.mrf.mxu1  ;;  %1873 = vmatmul.mubr.msk.f32.gmra.mxu0 %vm649_vm2, %v869_v17 }
  0xf1   : > { %v870_v24 = vmax.f32 %v854_v20, 0.0  ;;  %v795_v25 = vadd.f32 %v794_v23, %v600_v22  ;;  %v857_v27 = vadd.f32 %v2172_v60, %v800_v21 }
  0xf2   : > { %v1851_v28 = vpop.f32.mrf.mxu1 }
  0xf3   : > { %v856_v29 = vadd.f32 %v2172_v60, %v795_v25  ;;  %v810_v30 = vadd.f32 %v1851_v28, %v1819_v46  ;;  %1875 = vmatprep.mubr.msk.f32.mxu0 %vm649_vm2, %v870_v24  ;;  %v873_v34 = vmax.f32 %v857_v27, 0.0 }
  0xf4   : > { %v804_v31 = vpop.f32.mrf.mxu1  ;;  %1876 = vmatmul.mubr.msk.f32.gmra.mxu0 %vm649_vm2, %v871_v26 }
  0xf5   : > { %v872_v32 = vmax.f32 %v856_v29, 0.0  ;;  %v805_v33 = vadd.f32 %v804_v31, %v610_v47  ;;  %v859_v35 = vadd.f32 %v2172_v60, %v810_v30 }
  0xf6   : > { %v1854_v36 = vpop.f32.mrf.mxu1 }
  0xf7   : > { %v858_v37 = vadd.f32 %v2172_v60, %v805_v33  ;;  %v820_v38 = vadd.f32 %v1854_v36, %v1822_v49  ;;  %1878 = vmatprep.mubr.msk.f32.mxu0 %vm649_vm2, %v872_v32  ;;  %v875_v42 = vmax.f32 %v859_v35, 0.0 }
  0xf8   : > { %v814_v39 = vpop.f32.mrf.mxu1  ;;  %1879 = vmatmul.mubr.msk.f32.gmra.mxu0 %vm649_vm2, %v873_v34 }
  0xf9   : > { %v874_v40 = vmax.f32 %v858_v37, 0.0  ;;  %v815_v41 = vadd.f32 %v814_v39, %v2159_v50  ;;  %v861_v43 = vadd.f32 %v2172_v60, %v820_v38 }
  0xfa   : > { %v1857_v44 = vpop.f32.mrf.mxu1 }
  0xfb   : > { %v860_v45 = vadd.f32 %v2172_v60, %v815_v41  ;;  %v830_v46 = vadd.f32 %v1857_v44, %v2161_v52  ;;  %1881 = vmatprep.mubr.msk.f32.mxu0 %vm649_vm2, %v874_v40  ;;  %v877_v51 = vmax.f32 %v861_v43, 0.0 }
  0xfc   : > { %v824_v47 = vpop.f32.mrf.mxu1  ;;  %1882 = vmatmul.mubr.msk.f32.gmra.mxu0 %vm649_vm2, %v875_v42 }
  0xfd   : > { %v876_v48 = vmax.f32 %v860_v45, 0.0  ;;  %v825_v49 = vadd.f32 %v824_v47, %v2163_v53  ;;  %v863_v54 = vadd.f32 %v2172_v60, %v830_v46 }
  0xfe   : > { %v1860_v50 = vpop.f32.mrf.mxu1 }
  0xff   : > { %v862_v57 = vadd.f32 %v2172_v60, %v825_v49  ;;  %v840_v58 = vadd.f32 %v1860_v50, %v2165_v55  ;;  %1884 = vmatprep.mubr.msk.f32.mxu0 %vm649_vm2, %v876_v48  ;;  %v879_v62 = vmax.f32 %v863_v54, 0.0  ;;  %v1323_v55 = vld [vmem:[%s2305_s9 + $0x8] sm:$0xff] }
 0x100   : > { %v834_v59 = vpop.f32.mrf.mxu1  ;;  %1885 = vmatmul.mubr.msk.f32.gmra.mxu0 %vm649_vm2, %v877_v51  ;;  %1925 = vmatprep.subr.mxu0 %v1323_v55  ;;  %v1672_v51 = vld [vmem:[%s2304_s8] ss:$0 sm:$0xff] }
 0x101   : > { %v878_v52 = vmax.f32 %v862_v57, 0.0  ;;  %v835_v61 = vadd.f32 %v834_v59, %v2167_v56  ;;  %v865_v63 = vadd.f32 %v2172_v60, %v840_v58  ;;  %v1322_v56 = vld [vmem:[%s2305_s9] sm:$0xff]  ;;  %1926 = vmatpush3.msra.mxu0 %v1323_v55 }
 0x102   : > { %1927 = vmatprep.subr.mxu0 %v1322_v56 }
 0x103   : > { %v864_v53 = vadd.f32 %v2172_v60, %v835_v61  ;;  %1887 = vmatprep.mubr.msk.f32.mxu0 %vm649_vm2, %v878_v52  ;;  %v881_v1 = vmax.f32 %v865_v63, 0.0  ;;  %1928 = vmatpush3.msra.mxu0 %v1322_v56  ;;  %v1655_v60 = vld [vmem:[%s2302_s6] ss:$0 sm:$0xff] }
 0x104   : > { %1888 = vmatmul.mubr.msk.f32.gmra.mxu0 %vm649_vm2, %v879_v62 }
 0x105   : > { %v880_v0 = vmax.f32 %v864_v53, 0.0 }
 0x107   : > { %1890 = vmatprep.mubr.msk.f32.mxu0 %vm649_vm2, %v880_v0 }
 0x108   : > { %1891 = vmatmul.mubr.msk.f32.gmra.mxu0 %vm649_vm2, %v881_v1 }
 0x1ac   : > { %v1871_v2 = vpop.f32.mrf.mxu0 }
 0x1ad   : > { %v1013_v3 = vadd.f32 %v1871_v2, %v1655_v60 }
 0x1ae   : > { %v1007_v4 = vpop.f32.mrf.mxu0 }
 0x1af   : > { %v1008_v5 = vadd.f32 %v1655_v60, %v1007_v4  ;;  %v1087_v8 = vmax.f32 %v1013_v3, 0.0 }
 0x1b0   : > { %v1874_v6 = vpop.f32.mrf.mxu0 }
 0x1b1   : > { %v1086_v7 = vmax.f32 %v1008_v5, 0.0  ;;  %v1023_v9 = vadd.f32 %v1874_v6, %v1655_v60 }
 0x1b2   : > { %v1017_v10 = vpop.f32.mrf.mxu0 }
 0x1b3   : > { %v1018_v11 = vadd.f32 %v1655_v60, %v1017_v10  ;;  %1901 = vmatprep.mubr.msk.f32.mxu1 %vm649_vm2, %v1086_v7  ;;  %v1089_v14 = vmax.f32 %v1023_v9, 0.0 }
 0x1b4   : > { %v1877_v12 = vpop.f32.mrf.mxu0  ;;  %1902 = vmatmul.mubr.msk.f32.vlgmr.msra.gmra.mxu1 %vm649_vm2, %v1087_v8 }
 0x1b5   : > { %v1088_v13 = vmax.f32 %v1018_v11, 0.0  ;;  %v1033_v15 = vadd.f32 %v1877_v12, %v1655_v60 }
 0x1b6   : > { %v1027_v16 = vpop.f32.mrf.mxu0 }
 0x1b7   : > { %v1028_v17 = vadd.f32 %v1655_v60, %v1027_v16  ;;  %1904 = vmatprep.mubr.msk.f32.mxu1 %vm649_vm2, %v1088_v13  ;;  %v1091_v20 = vmax.f32 %v1033_v15, 0.0 }
 0x1b8   : > { %v1880_v18 = vpop.f32.mrf.mxu0  ;;  %1905 = vmatmul.mubr.msk.f32.gmra.mxu1 %vm649_vm2, %v1089_v14 }
 0x1b9   : > { %v1090_v19 = vmax.f32 %v1028_v17, 0.0  ;;  %v1043_v21 = vadd.f32 %v1880_v18, %v1655_v60 }
 0x1ba   : > { %v1037_v22 = vpop.f32.mrf.mxu0 }
 0x1bb   : > { %v1038_v23 = vadd.f32 %v1655_v60, %v1037_v22  ;;  %1907 = vmatprep.mubr.msk.f32.mxu1 %vm649_vm2, %v1090_v19  ;;  %v1093_v26 = vmax.f32 %v1043_v21, 0.0 }
 0x1bc   : > { %v1883_v24 = vpop.f32.mrf.mxu0  ;;  %1908 = vmatmul.mubr.msk.f32.gmra.mxu1 %vm649_vm2, %v1091_v20 }
 0x1bd   : > { %v1092_v25 = vmax.f32 %v1038_v23, 0.0  ;;  %v1053_v27 = vadd.f32 %v1883_v24, %v1655_v60 }
 0x1be   : > { %v1047_v28 = vpop.f32.mrf.mxu0 }
 0x1bf   : > { %v1048_v29 = vadd.f32 %v1655_v60, %v1047_v28  ;;  %1910 = vmatprep.mubr.msk.f32.mxu1 %vm649_vm2, %v1092_v25  ;;  %v1095_v32 = vmax.f32 %v1053_v27, 0.0 }
 0x1c0   : > { %v1886_v30 = vpop.f32.mrf.mxu0  ;;  %1911 = vmatmul.mubr.msk.f32.gmra.mxu1 %vm649_vm2, %v1093_v26 }
 0x1c1   : > { %v1094_v31 = vmax.f32 %v1048_v29, 0.0  ;;  %v1063_v33 = vadd.f32 %v1886_v30, %v1655_v60 }
 0x1c2   : > { %v1057_v34 = vpop.f32.mrf.mxu0 }
 0x1c3   : > { %v1058_v35 = vadd.f32 %v1655_v60, %v1057_v34  ;;  %1913 = vmatprep.mubr.msk.f32.mxu1 %vm649_vm2, %v1094_v31  ;;  %v1097_v38 = vmax.f32 %v1063_v33, 0.0 }
 0x1c4   : > { %v1889_v36 = vpop.f32.mrf.mxu0  ;;  %1914 = vmatmul.mubr.msk.f32.gmra.mxu1 %vm649_vm2, %v1095_v32 }
 0x1c5   : > { %v1096_v37 = vmax.f32 %v1058_v35, 0.0  ;;  %v1073_v39 = vadd.f32 %v1889_v36, %v1655_v60  ;;  %v1689_v35 = vld [vmem:[#allocation2] ss:$0 sm:$0xff] }
 0x1c6   : > { %v1067_v40 = vpop.f32.mrf.mxu0 }
 0x1c7   : > { %v1068_v41 = vadd.f32 %v1655_v60, %v1067_v40  ;;  %1916 = vmatprep.mubr.msk.f32.mxu1 %vm649_vm2, %v1096_v37  ;;  %v1099_v44 = vmax.f32 %v1073_v39, 0.0 }
 0x1c8   : > { %v1892_v42 = vpop.f32.mrf.mxu0  ;;  %1917 = vmatmul.mubr.msk.f32.gmra.mxu1 %vm649_vm2, %v1097_v38 }
 0x1c9   : > { %v1098_v43 = vmax.f32 %v1068_v41, 0.0  ;;  %v1083_v45 = vadd.f32 %v1892_v42, %v1655_v60 }
 0x1ca   : > { %v1077_v46 = vpop.f32.mrf.mxu0 }
 0x1cb   : > { %v1078_v47 = vadd.f32 %v1655_v60, %v1077_v46  ;;  %1919 = vmatprep.mubr.msk.f32.mxu1 %vm649_vm2, %v1098_v43  ;;  %v1101_v49 = vmax.f32 %v1083_v45, 0.0 }
 0x1cc   : > { %1920 = vmatmul.mubr.msk.f32.gmra.mxu1 %vm649_vm2, %v1099_v44 }
 0x1cd   : > { %v1100_v48 = vmax.f32 %v1078_v47, 0.0 }
 0x1cf   : > { %1922 = vmatprep.mubr.msk.f32.mxu1 %vm649_vm2, %v1100_v48 }
 0x1d0   : > { %1923 = vmatmul.mubr.msk.f32.gmra.mxu1 %vm649_vm2, %v1101_v49 }
 0x274   : > { %v1903_v54 = vpop.f32.mrf.mxu1 }
 0x275   : > { %v1233_v50 = vadd.f32 %v1903_v54, %v1672_v51 }
 0x276   : > { %v1227_v57 = vpop.f32.mrf.mxu1 }
 0x277   : > { %v1228_v58 = vadd.f32 %v1672_v51, %v1227_v57  ;;  %v1307_v61 = vmax.f32 %v1233_v50, 0.0 }
 0x278   : > { %v1906_v59 = vpop.f32.mrf.mxu1 }
 0x279   : > { %v1306_v52 = vmax.f32 %v1228_v58, 0.0  ;;  %v1243_v62 = vadd.f32 %v1906_v59, %v1672_v51 }
 0x27a   : > { %v1237_v63 = vpop.f32.mrf.mxu1 }
 0x27b   : > { %v1238_v53 = vadd.f32 %v1672_v51, %v1237_v63  ;;  %1929 = vmatprep.mubr.msk.f32.mxu0 %vm1331_vm3, %v1306_v52  ;;  %v1309_v55 = vmax.f32 %v1243_v62, 0.0 }
 0x27c   : > { %v1909_v0 = vpop.f32.mrf.mxu1  ;;  %1930 = vmatmul.mubr.msk.f32.vlgmr.msra.gmra.mxu0 %vm1331_vm3, %v1307_v61 }
 0x27d   : > { %v1308_v1 = vmax.f32 %v1238_v53, 0.0  ;;  %v1253_v56 = vadd.f32 %v1909_v0, %v1672_v51 }
 0x27e   : > { %v1247_v60 = vpop.f32.mrf.mxu1 }
 0x27f   : > { %v1248_v2 = vadd.f32 %v1672_v51, %v1247_v60  ;;  %1932 = vmatprep.mubr.msk.f32.mxu0 %vm1331_vm3, %v1308_v1  ;;  %v1311_v5 = vmax.f32 %v1253_v56, 0.0 }
 0x280   : > { %v1912_v3 = vpop.f32.mrf.mxu1  ;;  %1933 = vmatmul.mubr.msk.f32.gmra.mxu0 %vm1331_vm3, %v1309_v55 }
 0x281   : > { %v1310_v4 = vmax.f32 %v1248_v2, 0.0  ;;  %v1263_v6 = vadd.f32 %v1912_v3, %v1672_v51 }
 0x282   : > { %v1257_v7 = vpop.f32.mrf.mxu1 }
 0x283   : > { %v1258_v8 = vadd.f32 %v1672_v51, %v1257_v7  ;;  %1935 = vmatprep.mubr.msk.f32.mxu0 %vm1331_vm3, %v1310_v4  ;;  %v1313_v11 = vmax.f32 %v1263_v6, 0.0 }
 0x284   : > { %v1915_v9 = vpop.f32.mrf.mxu1  ;;  %1936 = vmatmul.mubr.msk.f32.gmra.mxu0 %vm1331_vm3, %v1311_v5 }
 0x285   : > { %v1312_v10 = vmax.f32 %v1258_v8, 0.0  ;;  %v1273_v12 = vadd.f32 %v1915_v9, %v1672_v51 }
 0x286   : > { %v1267_v13 = vpop.f32.mrf.mxu1 }
 0x287   : > { %v1268_v14 = vadd.f32 %v1672_v51, %v1267_v13  ;;  %1938 = vmatprep.mubr.msk.f32.mxu0 %vm1331_vm3, %v1312_v10  ;;  %v1315_v17 = vmax.f32 %v1273_v12, 0.0 }
 0x288   : > { %v1918_v15 = vpop.f32.mrf.mxu1  ;;  %1939 = vmatmul.mubr.msk.f32.gmra.mxu0 %vm1331_vm3, %v1313_v11 }
 0x289   : > { %v1314_v16 = vmax.f32 %v1268_v14, 0.0  ;;  %v1283_v18 = vadd.f32 %v1918_v15, %v1672_v51 }
 0x28a   : > { %v1277_v19 = vpop.f32.mrf.mxu1 }
 0x28b   : > { %v1278_v20 = vadd.f32 %v1672_v51, %v1277_v19  ;;  %1941 = vmatprep.mubr.msk.f32.mxu0 %vm1331_vm3, %v1314_v16  ;;  %v1317_v23 = vmax.f32 %v1283_v18, 0.0 }
 0x28c   : > { %v1921_v21 = vpop.f32.mrf.mxu1  ;;  %1942 = vmatmul.mubr.msk.f32.gmra.mxu0 %vm1331_vm3, %v1315_v17 }
 0x28d   : > { %v1316_v22 = vmax.f32 %v1278_v20, 0.0  ;;  %v1293_v24 = vadd.f32 %v1921_v21, %v1672_v51 }
 0x28e   : > { %v1287_v25 = vpop.f32.mrf.mxu1 }
 0x28f   : > { %v1288_v26 = vadd.f32 %v1672_v51, %v1287_v25  ;;  %1944 = vmatprep.mubr.msk.f32.mxu0 %vm1331_vm3, %v1316_v22  ;;  %v1319_v29 = vmax.f32 %v1293_v24, 0.0 }
 0x290   : > { %v1924_v27 = vpop.f32.mrf.mxu1  ;;  %1945 = vmatmul.mubr.msk.f32.gmra.mxu0 %vm1331_vm3, %v1317_v23 }
 0x291   : > { %v1318_v28 = vmax.f32 %v1288_v26, 0.0  ;;  %v1303_v30 = vadd.f32 %v1924_v27, %v1672_v51 }
 0x292   : > { %v1297_v31 = vpop.f32.mrf.mxu1 }
 0x293   : > { %v1298_v32 = vadd.f32 %v1672_v51, %v1297_v31  ;;  %1947 = vmatprep.mubr.msk.f32.mxu0 %vm1331_vm3, %v1318_v28  ;;  %v1321_v34 = vmax.f32 %v1303_v30, 0.0 }
 0x294   : > { %1948 = vmatmul.mubr.msk.f32.gmra.mxu0 %vm1331_vm3, %v1319_v29 }
 0x295   : > { %v1320_v33 = vmax.f32 %v1298_v32, 0.0 }
 0x297   : > { %1950 = vmatprep.mubr.msk.f32.mxu0 %vm1331_vm3, %v1320_v33 }
 0x298   : > { %1951 = vmatmul.mubr.msk.f32.gmra.mxu0 %vm1331_vm3, %v1321_v34 }
 0x33c   : > { %v1931_v36 = vpop.f32.mrf.mxu0 }
 0x33d   : > { %v1452_v37 = vadd.f32 %v1931_v36, %v1689_v35 }
 0x33e   : > { %v1446_v38 = vpop.f32.mrf.mxu0 }
 0x33f   : > { %1527 = vst.msk [vmem:[%s2259_s30 + $0x8] sm:$0xff] %vm1525_vm4, %v1452_v37  ;;  %v1447_v39 = vadd.f32 %v1689_v35, %v1446_v38 }
 0x340   : > { %v1934_v40 = vpop.f32.mrf.mxu0 }
 0x341   : > { %1526 = vst.msk [vmem:[%s2259_s30] sm:$0xff] %vm1525_vm4, %v1447_v39  ;;  %v1462_v41 = vadd.f32 %v1934_v40, %v1689_v35 }
 0x342   : > { %v1456_v42 = vpop.f32.mrf.mxu0 }
 0x343   : > { %1529 = vst.msk [vmem:[%s2259_s30 + $0x18] sm:$0xff] %vm1525_vm4, %v1462_v41  ;;  %v1457_v43 = vadd.f32 %v1689_v35, %v1456_v42 }
 0x344   : > { %v1937_v44 = vpop.f32.mrf.mxu0 }
 0x345   : > { %1528 = vst.msk [vmem:[%s2259_s30 + $0x10] sm:$0xff] %vm1525_vm4, %v1457_v43  ;;  %v1472_v45 = vadd.f32 %v1937_v44, %v1689_v35 }
 0x346   : > { %v1466_v46 = vpop.f32.mrf.mxu0 }
 0x347   : > { %1531 = vst.msk [vmem:[%s2259_s30 + $0x28] sm:$0xff] %vm1525_vm4, %v1472_v45  ;;  %v1467_v47 = vadd.f32 %v1689_v35, %v1466_v46 }
 0x348   : > { %v1940_v48 = vpop.f32.mrf.mxu0 }
 0x349   : > { %1530 = vst.msk [vmem:[%s2259_s30 + $0x20] sm:$0xff] %vm1525_vm4, %v1467_v47  ;;  %v1482_v49 = vadd.f32 %v1940_v48, %v1689_v35 }
 0x34a   : > { %v1476_v51 = vpop.f32.mrf.mxu0 }
 0x34b   : > { %1533 = vst.msk [vmem:[%s2259_s30 + $0x38] sm:$0xff] %vm1525_vm4, %v1482_v49  ;;  %v1477_v54 = vadd.f32 %v1689_v35, %v1476_v51 }
 0x34c   : > { %v1943_v50 = vpop.f32.mrf.mxu0 }
 0x34d   : > { %1532 = vst.msk [vmem:[%s2259_s30 + $0x30] sm:$0xff] %vm1525_vm4, %v1477_v54  ;;  %v1492_v57 = vadd.f32 %v1943_v50, %v1689_v35 }
 0x34e   : > { %v1486_v58 = vpop.f32.mrf.mxu0 }
 0x34f   : > { %1535 = vst.msk [vmem:[%s2259_s30 + $0x48] sm:$0xff] %vm1525_vm4, %v1492_v57  ;;  %v1487_v59 = vadd.f32 %v1689_v35, %v1486_v58 }
 0x350   : > { %v1946_v52 = vpop.f32.mrf.mxu0 }
 0x351   : > { %1534 = vst.msk [vmem:[%s2259_s30 + $0x40] sm:$0xff] %vm1525_vm4, %v1487_v59  ;;  %v1502_v61 = vadd.f32 %v1946_v52, %v1689_v35 }
 0x352   : > { %v1496_v62 = vpop.f32.mrf.mxu0 }
 0x353   : > { %1537 = vst.msk [vmem:[%s2259_s30 + $0x58] sm:$0xff] %vm1525_vm4, %v1502_v61  ;;  %v1497_v63 = vadd.f32 %v1689_v35, %v1496_v62 }
 0x354   : > { %v1949_v53 = vpop.f32.mrf.mxu0 }
 0x355   : > { %1536 = vst.msk [vmem:[%s2259_s30 + $0x50] sm:$0xff] %vm1525_vm4, %v1497_v63  ;;  %v1512_v0 = vadd.f32 %v1949_v53, %v1689_v35 }
 0x356   : > { %v1506_v1 = vpop.f32.mrf.mxu0 }
 0x357   : > { %1539 = vst.msk [vmem:[%s2259_s30 + $0x68] sm:$0xff] %vm1525_vm4, %v1512_v0  ;;  %v1507_v55 = vadd.f32 %v1689_v35, %v1506_v1 }
 0x358   : > { %v1952_v56 = vpop.f32.mrf.mxu0 }
 0x359   : > { %1538 = vst.msk [vmem:[%s2259_s30 + $0x60] sm:$0xff] %vm1525_vm4, %v1507_v55  ;;  %v1522_v60 = vadd.f32 %v1952_v56, %v1689_v35 }
 0x35a   : > { %v1516_v2 = vpop.f32.mrf.mxu0 }
 0x35b   : > { %1541 = vst.msk [vmem:[%s2259_s30 + $0x78] sm:$0xff] %vm1525_vm4, %v1522_v60  ;;  %v1517_v3 = vadd.f32 %v1689_v35, %v1516_v2 }
 0x35d   : > { %1540 = vst.msk [vmem:[%s2259_s30 + $0x70] sm:$0xff] %vm1525_vm4, %v1517_v3 }
 0x35e PF: > { %s23_s19 = sadd.s32 1, %s1969_s19  }
 0x35f   : > { %p20_p4 = scmp.ge.s32.totalorder %s23_s19, 4  }
 0x361   :  { %22 = sbr.rel (!%p20_p4) target bundleno = 3 (0x3), region = 97 }

</bundles_post_ra>
